<compile_context>
chip_gen: v7x
topology: tpu7x:2x2x1
jax: 0.10.0
libtpu: 0.0.40
codegen_flags: <defaults>
</compile_context>

<pallas_src>
import functools

import jax
import jax.numpy as jnp
from jax import lax
from jax.experimental import pallas as pl
from jax.experimental.pallas import tpu as pltpu


# ----------------------------------------------------------------------------
# Kernels
# ----------------------------------------------------------------------------
def _gram_mse_single_kernel(scale_ref, feat_ref, target_ref, loss_ref, *,
                            inv_nelems):
    """Whole problem resident in VMEM: gram + weighted MSE in one step.

    scale_ref  : (1, 1) f32 in SMEM  = weight / (a*b*c*d)
    feat_ref   : (N, M) feature matrix                      [VMEM]
    target_ref : (N, N) precomputed style target gram       [VMEM]
    loss_ref   : (1, 1) scalar MSE loss                     [SMEM]
    """
    f = feat_ref[...]
    # A @ A.T, contracting the lane (c*d) axis; MXU accumulates in f32.
    # (Review note: verify with pl.lower_as_mlir that Mosaic does not emit a
    #  per-step XLU transpose for the rhs when tuning very large N.)
    g = lax.dot_general(
        f, f,
        dimension_numbers=(((1,), (1,)), ((), ())),
        preferred_element_type=jnp.float32,
    )
    g = g * scale_ref[0, 0]
    diff = g - target_ref[...].astype(jnp.float32)
    loss_ref[0, 0] = jnp.sum(diff * diff) * inv_nelems


def _gram_partial_kernel(feat_ref, partial_ref):
    """Streamed gram accumulation into the resident (1, N, N) f32 output block.

    grid = (n_splits, steps_per_split); the split axis is "parallel" (v7x
    megacore), the step axis is the "arbitrary" reduction over c*d tiles.
    """
    k = pl.program_id(1)

    @pl.when(k == 0)
    def _init():
        partial_ref[...] = jnp.zeros_like(partial_ref)

    f = feat_ref[...]
    partial_ref[0, :, :] += lax.dot_general(
        f, f,
        dimension_numbers=(((1,), (1,)), ((), ())),
        preferred_element_type=jnp.float32,
    )


# ----------------------------------------------------------------------------
# Planning helpers
# ----------------------------------------------------------------------------
def _vmem_capacity_bytes():
    """Per-core VMEM capacity; conservative v7x fallback if the query fails."""
    try:
        info = pltpu.get_tpu_info()
        for name in ("vmem_capacity_bytes", "vmem_size_bytes", "vmem_bytes"):
            v = getattr(info, name, None)
            if v:
                return int(v)
    except Exception:
        pass
    return 64 << 20


def _round_up(x, m):
    return -(-x // m) * m


def _plan_tiles(N, M, feat_itemsize, n_splits, total_budget, max_tile_m=None):
    """Pick the streamed feature-tile width (multiple of 128 lanes).

    Returns (tm, m_pad, steps_per_split) where m_pad is M zero-padded so it
    divides evenly into n_splits * steps_per_split tiles of width tm.
    """
    # Resident VMEM in the tiled kernel: the (1, N, N) f32 output block
    # (count two buffers to be safe) plus a compiler-scratch margin.
    resident = 2 * N * N * 4 + (1 << 20)
    feat_budget = max(total_budget - resident, 2 << 20)
    # Double-buffered feature tile; >= ~1 MiB per step amortizes the ~0.35 us
    # per-grid-step overhead, > 8 MiB per buffer has diminishing returns.
    per_buf_cap = min(feat_budget // 2, 8 << 20)
    cap_lanes = max(128, (per_buf_cap // (N * feat_itemsize)) // 128 * 128)
    if max_tile_m is not None:
        cap_lanes = max(128, min(cap_lanes, (int(max_tile_m) // 128) * 128))
    limit = min(cap_lanes, _round_up(M, 128))

    # Minimum lanes for a ~1 MiB DMA per step (never above the hard limit).
    min_lanes = min(limit, max(128, _round_up((1 << 20) // (N * feat_itemsize), 128)))

    # Prefer a multiple-of-128 divisor of M (no padding) if it still gives a
    # reasonably large per-step DMA; otherwise zero-pad M.
    best_div = None
    t = 128
    while t <= min(limit, M):
        if M % t == 0:
            best_div = t
        t += 128

    if best_div is not None and best_div >= min_lanes:
        tm = best_div
    else:
        # Bound padded waste to roughly M/8 while keeping the DMA large.
        waste_cap = max(128, (M // (8 * n_splits)) // 128 * 128)
        tm = min(limit, max(min_lanes, waste_cap))

    m_pad = _round_up(M, tm * n_splits)
    steps_per_split = m_pad // tm // n_splits
    return tm, m_pad, steps_per_split


# ----------------------------------------------------------------------------
# Wrapper (forward pass of Style_Loss)
# ----------------------------------------------------------------------------
def style_loss_forward(x, target, weight, *, stream_dtype=None, num_splits=1,
                       force_tiled=False, max_tile_m=None):
    """Pallas implementation of Style_Loss.forward.

    Returns (out, loss): `out` is value-identical to `x` (the module's
    INPUT.clone(); JAX arrays are immutable so no copy is materialized), and
    `loss` is MSE(gram(x) * weight, target).

    stream_dtype : optionally stream features in bf16 (HBM-bound kernel ->
                   ~2x less traffic for f32 inputs; f32 accumulation kept).
    num_splits   : 2 splits the c*d reduction over both v7x TensorCores.
    """
    a, b, c, d = x.shape
    N, M = a * b, c * d
    feat = x.reshape(N, M)
    if stream_dtype is not None:
        feat = feat.astype(stream_dtype)
    fi = jnp.dtype(feat.dtype).itemsize
    ti = jnp.dtype(target.dtype).itemsize

    norm = 1.0 / float(a * b * c * d)
    inv_nelems = 1.0 / float(N * N)

    vmem_cap = _vmem_capacity_bytes()
    # Total kernel footprint budget: ~64 MiB on v5e/v6e (128 MiB VMEM),
    # ~48 MiB on v7x (64 MiB VMEM); scoped limit raised explicitly below.
    total_budget = max(min(vmem_cap - (16 << 20), 64 << 20), 8 << 20)
    vmem_limit = int(min(vmem_cap, total_budget + (8 << 20)))

    # ---------------- Path A: whole problem fits in VMEM ----------------
    single_step_bytes = 2 * N * M * fi + 2 * N * N * ti + (1 << 20)
    if not force_tiled and single_step_bytes <= total_budget:
        scale = jnp.asarray(weight, jnp.float32).reshape(1, 1) * jnp.float32(norm)
        kernel = functools.partial(_gram_mse_single_kernel, inv_nelems=inv_nelems)
        cost = pl.CostEstimate(
            flops=2 * N * N * M,
            transcendentals=0,
            bytes_accessed=N * M * fi + N * N * ti + 12,
        )
        loss = pl.pallas_call(
            kernel,
            grid=(1,),
            in_specs=[
                pl.BlockSpec(memory_space=pltpu.SMEM),     # scale scalar
                pl.BlockSpec((N, M), lambda i: (0, 0)),    # full feature map
                pl.BlockSpec((N, N), lambda i: (0, 0)),    # target gram
            ],
            out_specs=pl.BlockSpec(memory_space=pltpu.SMEM),
            out_shape=jax.ShapeDtypeStruct((1, 1), jnp.float32),
            compiler_params=pltpu.CompilerParams(
                dimension_semantics=("arbitrary",),
                vmem_limit_bytes=vmem_limit,
            ),
            cost_estimate=cost,
        )(scale, feat, target)
        return x, loss[0, 0]

    # ---------------- Path B: tiled streaming over c*d ----------------
    n_splits = max(1, int(num_splits))
    tm, m_pad, steps = _plan_tiles(N, M, fi, n_splits, total_budget, max_tile_m)
    if m_pad != M:
        # Zero columns contribute nothing to feature @ feature.T.
        feat = jnp.pad(feat, ((0, 0), (0, m_pad - M)))

    cost = pl.CostEstimate(
        flops=2 * N * N * m_pad,
        transcendentals=0,
        bytes_accessed=N * m_pad * fi + n_splits * N * N * 4,
    )
    partials = pl.pallas_call(
        _gram_partial_kernel,
        grid=(n_splits, steps),
        in_specs=[
            pl.BlockSpec((N, tm), lambda p, k: (0, p * steps + k)),
        ],
        out_specs=pl.BlockSpec((1, N, N), lambda p, k: (p, 0, 0)),
        out_shape=jax.ShapeDtypeStruct((n_splits, N, N), jnp.float32),
        compiler_params=pltpu.CompilerParams(
            dimension_semantics=("parallel", "arbitrary"),
            vmem_limit_bytes=vmem_limit,
        ),
        cost_estimate=cost,
    )(feat)

    # Tiny finalize in plain JAX: combine per-split partial grams, scale, MSE.
    g = jnp.sum(partials, axis=0) * (jnp.asarray(weight, jnp.float32) * jnp.float32(norm))
    diff = g - target.astype(jnp.float32)
    loss = jnp.mean(diff * diff)
    return x, loss


def _gram_ref(x):
    """Plain-JAX reference of the Gram module (builds the target / checks)."""
    a, b, c, d = x.shape
    feat = x.reshape(a * b, c * d).astype(jnp.float32)
    return (feat @ feat.T) / float(a * b * c * d)


if __name__ == "__main__":
    key = jax.random.PRNGKey(0)
    k_style, k_input = jax.random.split(key)

    # NCHW conv feature map: N = a*b = 8, M = c*d = 256.
    a, b, c, d = 2, 4, 16, 16
    weight = 0.5

    # Deterministic "style" feature map -> target gram (what __init__ receives).
    style_feat = jax.random.normal(k_style, (a, b, c, d), dtype=jnp.float32)
    target = _gram_ref(style_feat) * weight  # (a*b, a*b)

    x = jax.random.normal(k_input, (a, b, c, d), dtype=jnp.float32)

    g_ref = _gram_ref(x) * weight
    loss_ref = jnp.mean((g_ref - target) ** 2)

    # 1) Small-problem fast path (single step, in-kernel weighted MSE).
    out, loss = style_loss_forward(x, target, weight)
    jax.block_until_ready((out, loss))
    assert out.shape == x.shape and bool(jnp.allclose(out, x))
    assert jnp.allclose(loss, loss_ref, rtol=1e-5, atol=1e-6), (loss, loss_ref)

    # 2) Tiled streaming path (grid over the c*d reduction).
    _, loss_t = style_loss_forward(x, target, weight,
                                   force_tiled=True, max_tile_m=128)
    jax.block_until_ready(loss_t)
    assert jnp.allclose(loss_t, loss_ref, rtol=1e-5, atol=1e-6), (loss_t, loss_ref)

    # 3) Two-way parallel split (uses both TensorCores on v7x; sequential and
    #    still correct on single-core chips).
    _, loss_p = style_loss_forward(x, target, weight, force_tiled=True,
                                   num_splits=2, max_tile_m=128)
    jax.block_until_ready(loss_p)
    assert jnp.allclose(loss_p, loss_ref, rtol=1e-5, atol=1e-6), (loss_p, loss_ref)

    # 4) bf16 streaming (halves HBM traffic; tolerance relaxed by design).
    _, loss_bf = style_loss_forward(x, target, weight,
                                    stream_dtype=jnp.bfloat16)
    jax.block_until_ready(loss_bf)
    feat_bf = x.reshape(a * b, c * d).astype(jnp.bfloat16).astype(jnp.float32)
    g_bf = (feat_bf @ feat_bf.T) / float(a * b * c * d) * weight
    loss_bf_ref = jnp.mean((g_bf - target) ** 2)
    assert jnp.allclose(loss_bf, loss_bf_ref, rtol=1e-2, atol=1e-4), (loss_bf, loss_bf_ref)

    print("KERNEL_OK")
</pallas_src>

<mosaic_0001>
module attributes {stable_mosaic.version = 11 : i64} {
  func.func @_gram_mse_single_kernel(%arg0: i32, %arg1: memref<1x1xf32, #tpu.memory_space<smem>>, %arg2: memref<8x256xf32, #tpu.memory_space<vmem>>, %arg3: memref<8x8xf32, #tpu.memory_space<vmem>>, %arg4: memref<1x1xf32, #tpu.memory_space<smem>>) attributes {dimension_semantics = [#tpu.dimension_semantics<arbitrary>], iteration_bounds = array<i64: 1>, scalar_prefetch = 0 : i64, scratch_operands = 0 : i64, tpu.core_type = #tpu.core_type<tc>, window_params = [{transform_indices = @transform_0, window_bounds = array<i64: 1, 1>}, {pipeline_mode = #tpu.pipeline_mode<synchronous>, transform_indices = @transform_1, window_bounds = array<i64: 8, 256>}, {pipeline_mode = #tpu.pipeline_mode<synchronous>, transform_indices = @transform_2, window_bounds = array<i64: 8, 8>}, {transform_indices = @transform_3, window_bounds = array<i64: 1, 1>}]} {
    %c0 = arith.constant 0 : index
    %c0_0 = arith.constant 0 : index
    %0 = vector.load %arg2[%c0, %c0_0] : memref<8x256xf32, #tpu.memory_space<vmem>>, vector<8x256xf32>
    %cst = arith.constant dense<0.000000e+00> : vector<8x8xf32>
    %1 = tpu.matmul %0, %0, %cst {dimension_numbers = #tpu.dot_dimension_numbers<[1], [1], [0], [0], [0, 0, 1, 0], [], []>} : vector<8x256xf32>, vector<8x256xf32>, vector<8x8xf32> -> vector<8x8xf32>
    %c0_1 = arith.constant 0 : index
    %c0_2 = arith.constant 0 : index
    %2 = memref.load %arg1[%c0_1, %c0_2] : memref<1x1xf32, #tpu.memory_space<smem>>
    %3 = vector.broadcast %2 : f32 to vector<8x8xf32>
    %4 = arith.mulf %1, %3 : vector<8x8xf32>
    %c0_3 = arith.constant 0 : index
    %c0_4 = arith.constant 0 : index
    %5 = vector.load %arg3[%c0_3, %c0_4] : memref<8x8xf32, #tpu.memory_space<vmem>>, vector<8x8xf32>
    %6 = arith.subf %4, %5 : vector<8x8xf32>
    %7 = arith.mulf %6, %6 : vector<8x8xf32>
    %8 = vector.shape_cast %7 : vector<8x8xf32> to vector<1x8x8xf32>
    %cst_5 = arith.constant dense<0.000000e+00> : vector<1xf32>
    %9 = vector.multi_reduction <add>, %8, %cst_5 [1, 2] : vector<1x8x8xf32> to vector<1xf32>
    %10 = vector.shape_cast %9 : vector<1xf32> to vector<1x1x1xf32>
    %11 = vector.extract %10[0, 0, 0] : f32 from vector<1x1x1xf32>
    %cst_6 = arith.constant 1.562500e-02 : f32
    %12 = arith.mulf %11, %cst_6 : f32
    %c0_7 = arith.constant 0 : index
    %c0_8 = arith.constant 0 : index
    %13 = memref.load %arg4[%c0_7, %c0_8] : memref<1x1xf32, #tpu.memory_space<smem>>
    memref.store %12, %arg4[%c0_7, %c0_8] : memref<1x1xf32, #tpu.memory_space<smem>>
    return
  }
  func.func @transform_0(%arg0: i32) -> (i32, i32) {
    %c0_i32 = arith.constant 0 : i32
    %c0_i32_0 = arith.constant 0 : i32
    %c0_i32_1 = arith.constant 0 : i32
    return %c0_i32, %c0_i32_0 : i32, i32
  }
  func.func @transform_1(%arg0: i32) -> (i32, i32) {
    %c0_i32 = arith.constant 0 : i32
    %c0_i32_0 = arith.constant 0 : i32
    %c0_i32_1 = arith.constant 0 : i32
    return %c0_i32, %c0_i32_0 : i32, i32
  }
  func.func @transform_2(%arg0: i32) -> (i32, i32) {
    %c0_i32 = arith.constant 0 : i32
    %c0_i32_0 = arith.constant 0 : i32
    %c0_i32_1 = arith.constant 0 : i32
    return %c0_i32, %c0_i32_0 : i32, i32
  }
  func.func @transform_3(%arg0: i32) -> (i32, i32) {
    %c0_i32 = arith.constant 0 : i32
    %c0_i32_0 = arith.constant 0 : i32
    %c0_i32_1 = arith.constant 0 : i32
    return %c0_i32, %c0_i32_0 : i32, i32
  }
}

</mosaic_0001>

<bundles_post_ra>
// kernel: tpu_custom_call.1
= control target key start
LH: loop header
LB: loop body
LE: loop exit
PB: predicated region body
PF: predicated region fallthrough
CT: control target
= control target key end

     0   :  { %9 = vsyncpa [#allocation4], 0  ;;  %s274_s0 = inlined_call_operand.<no memory space> [shape: f32[1,1], index: 0, kind: input, shape index: {}]   ;;  %s275_s1 = inlined_call_operand.hbm [shape: f32[8,256], index: 1, kind: input, shape index: {}]   ;;  %s276_s2 = inlined_call_operand.hbm [shape: f32[8,8], index: 2, kind: input, shape index: {}]   ;;  %s277_s3 = inlined_call_operand.hbm [shape: f32[1,1], index: 3, kind: output, shape index: {}]  }
   0x1   :  { %10 = vsyncpa [#allocation7], 0 }
   0x2   :  { %11 = vsyncpa [#allocation5], 0  ;;  %s212_s12 = smov [#allocation3]   ;;  %s213_s14 = smov [#allocation6]  }
   0x3   :  { %s20_s13 = sshll.u32 %s212_s12, 4  ;;  %s30_s15 = sshll.u32 %s213_s14, 4  ;;  %s21_s13 = int_to_ptr.vmem [resolvable:$true] %s20_s13  ;;  %s31_s15 = int_to_ptr.vmem [resolvable:$true] %s30_s15 }
   0x4   :  { %s152_s18 = scalar_lea.hbm %s275_s1, 256 }
   0x5   :  { %p153_p0 = scmp.ne.s32.totalorder %s275_s1, %s152_s18  ;;  %p156_p1 = scmp.lt.u32.totalorder %s152_s18, %s275_s1 }
   0x7   :  { %p158_p2 = pnand %p156_p1, %p153_p0 }
   0x9   :  { %161 = shalt.err (!%p158_p2)
}
   0xa   :  { %s162_s23 = scalar_lea.vmem %s21_s13, 256  ;;  %p167_p4 = scmp.lt.s32.totalorder %s21_s13, %s21_s13 }
   0xb   :  { %p163_p3 = scmp.ne.s32.totalorder %s21_s13, %s162_s23  ;;  %p168_p5 = scmp.lt.s32.totalorder %s162_s23, %s162_s23 }
   0xd   :  { %p169_p6 = por %p168_p5, %p167_p4 }
   0xf   :  { %p170_p7 = pnand %p169_p6, %p163_p3 }
  0x11   :  { %173 = shalt.err (!%p170_p7)
}
  0x12   :  { %23 = dma.hbm_to_vmem [thread:$0]  %s275_s1, 256, %s21_s13, [#allocation4]  }
  0x13   :  { %s174_s28 = scalar_lea.hbm %s276_s2, 128 }
  0x14   :  { %p175_p8 = scmp.ne.s32.totalorder %s276_s2, %s174_s28  ;;  %p178_p9 = scmp.lt.u32.totalorder %s174_s28, %s276_s2 }
  0x16   :  { %p180_p10 = pnand %p178_p9, %p175_p8 }
  0x18   :  { %183 = shalt.err (!%p180_p10)
}
  0x19   :  { %s184_s6 = scalar_lea.vmem %s31_s15, 128  ;;  %p189_p12 = scmp.lt.s32.totalorder %s31_s15, %s31_s15 }
  0x1a   :  { %p185_p11 = scmp.ne.s32.totalorder %s31_s15, %s184_s6  ;;  %p190_p13 = scmp.lt.s32.totalorder %s184_s6, %s184_s6 }
  0x1c   :  { %p191_p0 = por %p190_p13, %p189_p12 }
  0x1e   :  { %p192_p1 = pnand %p191_p0, %p185_p11 }
  0x20   :  { %195 = shalt.err (!%p192_p1)
}
  0x21   :  { %33 = dma.hbm_to_vmem [thread:$0]  %s276_s2, 128, %s31_s15, [#allocation7]  }
  0x22   :  { %206 = dma.done.wait [#allocation4], 256  }
  0x23   :  { %207 = vsyncadd [#allocation4], 4294967040 }
  0x24   :  { %208 = dma.done.wait [#allocation7], 128  }
  0x25   :  { %209 = vsyncadd [#allocation7], 4294967168  ;;  %v41_v0 = vld [vmem:[#allocation3 + $0x8] sm:$0xff]  ;;  %v40_v1 = vld [vmem:[#allocation3] sm:$0xff]  ;;  %v113_v2 = vstv %s274_s0  ;;  %vm118_vm0 = vcmask 64512   ;;  %s196_s12 = scalar_lea.hbm %s277_s3, 16 }
  0x26   :  { %42 = vmatprep.subr.mxu0 %v41_v0  ;;  %106 = vmatprep.mubr.f32.mxu0 %v41_v0  ;;  %v115_v4 = vld [vmem:[#allocation6] sm:$0xff]  ;;  %p197_p2 = scmp.ne.s32.totalorder %s277_s3, %s196_s12  ;;  %p200_p3 = scmp.lt.u32.totalorder %s196_s12, %s277_s3 }
  0x27   :  { %43 = vmatpush1.xpose.msra.mxu0 %v40_v1 }
  0x28   :  { %p202_p4 = pnand %p200_p3, %p197_p2 }
  0x2a   :  { %107 = vmatmul.mubr.f32.vlgmr.msra.gmra.mrb[0].mxu0 %v40_v1 }
  0xfd   :  { %v108_v3 = vpop.f32.mrb[0].mxu0 }
  0xfe   :  { %v114_v5 = vmul.f32 %v113_v2, %v108_v3  ;;  %v110_v6 = vpop.f32.mrb[1].mxu0 }
 0x100   :  { %v116_v7 = vsub.f32 %v114_v5, %v115_v4 }
 0x102   :  { %v117_v8 = vmul.f32 %v116_v7, %v116_v7 }
 0x104   :  { %v119_v9 = vsel %vm118_vm0, %v117_v8, 0.0 }
 0x105   :  { %120 = vadd.xlane.f32.xlu0 %v119_v9 }
 0x192   :  { %v121_v10 = vpop.xlane.xlu0 %120 }
 0x193   :  { %v122_v11 = vrot.slane %v121_v10, 4 }
 0x195   :  { %v123_v12 = vadd.f32 %v122_v11, %v121_v10 }
 0x197   :  { %v124_v13 = vrot.slane %v123_v12, 2 }
 0x199   :  { %v125_v14 = vadd.f32 %v124_v13, %v123_v12 }
 0x19b   :  { %v126_v15 = vrot.slane %v125_v14, 1 }
 0x19d   :  { %v127_v16 = vadd.f32 %v126_v15, %v125_v14 }
 0x19f   :  { %147 = vpush %v127_v16 }
 0x1d0   :  { %s148_s2 = spop %147 }
 0x1d1   :  { %s129_s10 = smul.f32 0.015625, %s148_s2 }
 0x1d3   :  { %131 = sst [smem:[#allocation8]] %s129_s10 }
 0x1d4   :  { %205 = shalt.err (!%p202_p4)
}
 0x1d5   :  { %s214_s17 = smov [#allocation8]  }
 0x1d6   :  { %139 = dma.smem_to_hbm %s214_s17, 16, %s277_s3, [#allocation5]  }
 0x1d7   :  { %210 = dma.done.wait [#allocation5], 16  }
 0x1d8   :  { %211 = vsyncadd [#allocation5], 4294967280 }
 0x1d9   :  { %143 = sfence }
 0x1da   :  { %144 = vsyncpa [#allocation4], 1 }
 0x1db   :  { %145 = vsyncpa [#allocation7], 1 }
 0x1dc   :  { %146 = vsyncpa [#allocation5], 1 }

</bundles_post_ra>
